<compile_context>
chip_gen: v7x
topology: tpu7x:2x2x1
jax: 0.10.0
libtpu: 0.0.40
codegen_flags: <defaults>
</compile_context>

<pallas_src>
import functools

import jax
import jax.numpy as jnp
from jax import lax
from jax.experimental import pallas as pl
from jax.experimental.pallas import tpu as pltpu

BN_EPS = 1e-5


def _shift_lanes_zero_fill(x, s):
    """y[:, l] = x[:, l + s] for 0 <= l + s < L, else 0.  `s` is a static int."""
    C, L = x.shape
    if s == 0:
        return x
    if abs(s) >= L:
        return jnp.zeros_like(x)
    if s > 0:
        pad = jnp.zeros((C, s), x.dtype)
        return jnp.concatenate([x[:, s:], pad], axis=1)
    pad = jnp.zeros((C, -s), x.dtype)
    return jnp.concatenate([pad, x[:, :L + s]], axis=1)


def _conv_stats_kernel(x_ref, w_ref, b_ref, conv_ref, stats_ref):
    """Per-batch Conv1d('same', stride=1) + bias, plus per-channel sum / sumsq.

    x_ref:     (1, C_in, L)       one batch, NCL layout (L on lanes)
    w_ref:     (K, C_out, C_in)   conv weights, tap-major
    b_ref:     (C_out, 1)         conv bias
    conv_ref:  (1, C_out, L)      conv output (f32)
    stats_ref: (1, C_out, 2)      [..., 0] = sum over L, [..., 1] = sum of squares
    """
    K = w_ref.shape[0]
    C_out = w_ref.shape[1]
    L = x_ref.shape[2]
    pad_left = (K - 1) // 2          # PyTorch 'same' split (stride=1)

    x = x_ref[0]                     # (C_in, L)

    acc = jnp.zeros((C_out, L), jnp.float32)
    for k in range(K):               # K is small & static -> unrolled taps
        xk = _shift_lanes_zero_fill(x, k - pad_left)      # (C_in, L)
        acc = acc + lax.dot_general(
            w_ref[k], xk,                                 # (C_out,C_in) x (C_in,L)
            dimension_numbers=(((1,), (0,)), ((), ())),
            preferred_element_type=jnp.float32)           # (C_out, L)
    acc = acc + b_ref[...]           # (C_out, 1) broadcast over lanes

    conv_ref[0] = acc

    # Single-pass batch-norm statistics (lane reductions -> XLU).
    s1 = jnp.sum(acc, axis=1, keepdims=True)              # (C_out, 1)
    s2 = jnp.sum(acc * acc, axis=1, keepdims=True)        # (C_out, 1)
    stats_ref[0, :, 0:1] = s1
    stats_ref[0, :, 1:2] = s2


def _bn_relu_kernel(conv_ref, scale_ref, shift_ref, out_ref):
    """y = relu(conv * scale + shift) — one FMA + max per element."""
    y = conv_ref[0] * scale_ref[...] + shift_ref[...]
    out_ref[0] = jnp.maximum(y, 0.0).astype(out_ref.dtype)


@functools.partial(jax.jit, static_argnames=("kernel_size", "compute_dtype"))
def cnn_layer(x, weight, bias, gamma, beta, *, kernel_size,
              compute_dtype=jnp.float32):
    """x: (N, C_in, L) (PyTorch NCL).  Returns (N, C_out, L) float32.

    compute_dtype: dtype fed to the MXU for the conv (jnp.bfloat16 is a good
    choice on v6e/v7x; keep jnp.float32 on v5e / when exact f32 conv is needed).
    BN statistics and the normalize+ReLU pass are always f32.
    """
    N, C_in, L = x.shape
    C_out = weight.shape[0]
    K = kernel_size

    x_in = x.astype(compute_dtype)
    w_kio = jnp.transpose(weight, (2, 0, 1)).astype(compute_dtype)  # (K,C_out,C_in), tiny
    b2 = bias.reshape(C_out, 1).astype(jnp.float32)

    # ---- pass 1: conv + bias + per-batch channel stats ----------------------
    conv_out, stats = pl.pallas_call(
        _conv_stats_kernel,
        out_shape=(jax.ShapeDtypeStruct((N, C_out, L), jnp.float32),
                   jax.ShapeDtypeStruct((N, C_out, 2), jnp.float32)),
        grid=(N,),
        in_specs=[pl.BlockSpec((1, C_in, L), lambda n: (n, 0, 0)),
                  pl.BlockSpec((K, C_out, C_in), lambda n: (0, 0, 0)),
                  pl.BlockSpec((C_out, 1), lambda n: (0, 0))],
        out_specs=(pl.BlockSpec((1, C_out, L), lambda n: (n, 0, 0)),
                   pl.BlockSpec((1, C_out, 2), lambda n: (n, 0, 0))),
        compiler_params=pltpu.CompilerParams(
            dimension_semantics=("parallel",)),
    )(x_in, w_kio, b2)

    # ---- tiny JAX glue: fold BN(batch stats) + affine into scale/shift ------
    cnt = jnp.float32(N * L)
    totals = jnp.sum(stats, axis=0)                        # (C_out, 2)
    mean = totals[:, 0] / cnt
    var = jnp.maximum(totals[:, 1] / cnt - mean * mean, 0.0)   # biased, as PyTorch BN(train)
    inv = lax.rsqrt(var + BN_EPS)
    gamma_f = gamma.astype(jnp.float32)
    scale = (gamma_f * inv).reshape(C_out, 1)
    shift = (beta.astype(jnp.float32) - mean * gamma_f * inv).reshape(C_out, 1)

    # ---- pass 2: normalize + ReLU, written in place over the conv buffer ----
    y = pl.pallas_call(
        _bn_relu_kernel,
        out_shape=jax.ShapeDtypeStruct((N, C_out, L), jnp.float32),
        grid=(N,),
        in_specs=[pl.BlockSpec((1, C_out, L), lambda n: (n, 0, 0)),
                  pl.BlockSpec((C_out, 1), lambda n: (0, 0)),
                  pl.BlockSpec((C_out, 1), lambda n: (0, 0))],
        out_specs=pl.BlockSpec((1, C_out, L), lambda n: (n, 0, 0)),
        input_output_aliases={0: 0},
        compiler_params=pltpu.CompilerParams(
            dimension_semantics=("parallel",)),
    )(conv_out, scale, shift)
    return y


def _reference(x, weight, bias, gamma, beta, kernel_size):
    """Pure-JAX reference mirroring PyTorch Conv1d('same')+BN(train)+ReLU."""
    N, C_in, L = x.shape
    C_out = weight.shape[0]
    K = kernel_size
    pad_left = (K - 1) // 2
    pad_right = (K - 1) - pad_left
    x_nlc = jnp.transpose(x, (0, 2, 1)).astype(jnp.float32)
    xp = jnp.pad(x_nlc, ((0, 0), (pad_left, pad_right), (0, 0)))
    w_kio = jnp.transpose(weight, (2, 1, 0)).astype(jnp.float32)
    acc = jnp.zeros((N, L, C_out), jnp.float32)
    for k in range(K):
        acc = acc + jnp.einsum("nli,io->nlo", xp[:, k:k + L, :], w_kio[k])
    acc = acc + bias[None, None, :]
    mean = acc.mean(axis=(0, 1), keepdims=True)
    var = ((acc - mean) ** 2).mean(axis=(0, 1), keepdims=True)
    y = (acc - mean) * lax.rsqrt(var + BN_EPS) * gamma[None, None, :] + beta[None, None, :]
    y = jnp.maximum(y, 0.0)
    return jnp.transpose(y, (0, 2, 1))


if __name__ == "__main__":
    # Small shapes consistent with the module: batch=2, C_in=4, C_out=8, L=16, K=3.
    N, C_IN, C_OUT, L, K = 2, 4, 8, 16, 3

    key = jax.random.PRNGKey(0)
    kx, kw, kb, kg, kbe = jax.random.split(key, 5)

    x = jax.random.normal(kx, (N, C_IN, L), dtype=jnp.float32)
    weight = 0.1 * jax.random.normal(kw, (C_OUT, C_IN, K), dtype=jnp.float32)
    bias = 0.05 * jax.random.normal(kb, (C_OUT,), dtype=jnp.float32)
    gamma = 1.0 + 0.1 * jax.random.normal(kg, (C_OUT,), dtype=jnp.float32)
    beta = 0.1 * jax.random.normal(kbe, (C_OUT,), dtype=jnp.float32)

    out = cnn_layer(x, weight, bias, gamma, beta, kernel_size=K)
    out = jax.block_until_ready(out)

    ref = _reference(x, weight, bias, gamma, beta, K)
    assert out.shape == (N, C_OUT, L), out.shape
    assert jnp.allclose(out, ref, atol=1e-4, rtol=1e-4), "mismatch vs reference"

    print("KERNEL_OK")
</pallas_src>

<mosaic_0001>
module attributes {stable_mosaic.version = 11 : i64} {
  func.func @_conv_stats_kernel(%arg0: i32, %arg1: memref<1x4x16xf32, #tpu.memory_space<vmem>>, %arg2: memref<3x8x4xf32, #tpu.memory_space<vmem>>, %arg3: memref<8x1xf32, #tpu.memory_space<vmem>>, %arg4: memref<1x8x16xf32, #tpu.memory_space<vmem>>, %arg5: memref<1x8x2xf32, #tpu.memory_space<vmem>>) attributes {dimension_semantics = [#tpu.dimension_semantics<parallel>], iteration_bounds = array<i64: 2>, scalar_prefetch = 0 : i64, scratch_operands = 0 : i64, tpu.core_type = #tpu.core_type<tc>, window_params = [{transform_indices = @transform_0, window_bounds = array<i64: 1, 4, 16>}, {pipeline_mode = #tpu.pipeline_mode<synchronous>, transform_indices = @transform_1, window_bounds = array<i64: 3, 8, 4>}, {pipeline_mode = #tpu.pipeline_mode<synchronous>, transform_indices = @transform_2, window_bounds = array<i64: 8, 1>}, {transform_indices = @transform_3, window_bounds = array<i64: 1, 8, 16>}, {transform_indices = @transform_4, window_bounds = array<i64: 1, 8, 2>}]} {
    %c0 = arith.constant 0 : index
    %c0_0 = arith.constant 0 : index
    %c0_1 = arith.constant 0 : index
    %0 = vector.load %arg1[%c0, %c0_0, %c0_1] : memref<1x4x16xf32, #tpu.memory_space<vmem>>, vector<1x4x16xf32>
    %1 = vector.shape_cast %0 : vector<1x4x16xf32> to vector<4x16xf32>
    %cst = arith.constant 0.000000e+00 : f32
    %2 = vector.broadcast %cst : f32 to vector<8x16xf32>
    %cst_2 = arith.constant 0.000000e+00 : f32
    %3 = vector.broadcast %cst_2 : f32 to vector<4x1xf32>
    %4 = vector.extract_strided_slice %1 {offsets = [0, 0], sizes = [4, 15], strides = [1, 1]} : vector<4x16xf32> to vector<4x15xf32>
    %5 = tpu.concatenate %3, %4 in 1 : vector<4x1xf32>, vector<4x15xf32> -> vector<4x16xf32>
    %c0_3 = arith.constant 0 : index
    %c0_4 = arith.constant 0 : index
    %c0_5 = arith.constant 0 : index
    %6 = vector.load %arg2[%c0_3, %c0_4, %c0_5] : memref<3x8x4xf32, #tpu.memory_space<vmem>>, vector<1x8x4xf32>
    %7 = vector.shape_cast %6 : vector<1x8x4xf32> to vector<8x4xf32>
    %cst_6 = arith.constant dense<0.000000e+00> : vector<8x16xf32>
    %8 = tpu.matmul %7, %5, %cst_6 {dimension_numbers = #tpu.dot_dimension_numbers<[1], [0], [0], [1], [0, 0, 1, 1], [], []>} : vector<8x4xf32>, vector<4x16xf32>, vector<8x16xf32> -> vector<8x16xf32>
    %9 = arith.addf %2, %8 : vector<8x16xf32>
    %c1 = arith.constant 1 : index
    %c0_7 = arith.constant 0 : index
    %c0_8 = arith.constant 0 : index
    %10 = vector.load %arg2[%c1, %c0_7, %c0_8] : memref<3x8x4xf32, #tpu.memory_space<vmem>>, vector<1x8x4xf32>
    %11 = vector.shape_cast %10 : vector<1x8x4xf32> to vector<8x4xf32>
    %cst_9 = arith.constant dense<0.000000e+00> : vector<8x16xf32>
    %12 = tpu.matmul %11, %1, %cst_9 {dimension_numbers = #tpu.dot_dimension_numbers<[1], [0], [0], [1], [0, 0, 1, 1], [], []>} : vector<8x4xf32>, vector<4x16xf32>, vector<8x16xf32> -> vector<8x16xf32>
    %13 = arith.addf %9, %12 : vector<8x16xf32>
    %cst_10 = arith.constant 0.000000e+00 : f32
    %14 = vector.broadcast %cst_10 : f32 to vector<4x1xf32>
    %15 = vector.extract_strided_slice %1 {offsets = [0, 1], sizes = [4, 15], strides = [1, 1]} : vector<4x16xf32> to vector<4x15xf32>
    %16 = tpu.concatenate %15, %14 in 1 : vector<4x15xf32>, vector<4x1xf32> -> vector<4x16xf32>
    %c2 = arith.constant 2 : index
    %c0_11 = arith.constant 0 : index
    %c0_12 = arith.constant 0 : index
    %17 = vector.load %arg2[%c2, %c0_11, %c0_12] : memref<3x8x4xf32, #tpu.memory_space<vmem>>, vector<1x8x4xf32>
    %18 = vector.shape_cast %17 : vector<1x8x4xf32> to vector<8x4xf32>
    %cst_13 = arith.constant dense<0.000000e+00> : vector<8x16xf32>
    %19 = tpu.matmul %18, %16, %cst_13 {dimension_numbers = #tpu.dot_dimension_numbers<[1], [0], [0], [1], [0, 0, 1, 1], [], []>} : vector<8x4xf32>, vector<4x16xf32>, vector<8x16xf32> -> vector<8x16xf32>
    %20 = arith.addf %13, %19 : vector<8x16xf32>
    %c0_14 = arith.constant 0 : index
    %c0_15 = arith.constant 0 : index
    %21 = vector.load %arg3[%c0_14, %c0_15] : memref<8x1xf32, #tpu.memory_space<vmem>>, vector<8x1xf32>
    %22 = vector.broadcast %21 : vector<8x1xf32> to vector<8x16xf32>
    %23 = arith.addf %20, %22 : vector<8x16xf32>
    %c0_16 = arith.constant 0 : index
    %c0_17 = arith.constant 0 : index
    %c0_18 = arith.constant 0 : index
    %24 = vector.load %arg4[%c0_16, %c0_17, %c0_18] : memref<1x8x16xf32, #tpu.memory_space<vmem>>, vector<1x8x16xf32>
    %25 = vector.shape_cast %24 : vector<1x8x16xf32> to vector<8x16xf32>
    %26 = vector.shape_cast %23 : vector<8x16xf32> to vector<1x8x16xf32>
    tpu.vector_store %arg4[%c0_16, %c0_17, %c0_18], %26 {strides = array<i32>} : memref<1x8x16xf32, #tpu.memory_space<vmem>>, vector<1x8x16xf32>,
    %cst_19 = arith.constant dense<0.000000e+00> : vector<8xf32>
    %27 = vector.multi_reduction <add>, %23, %cst_19 [1] : vector<8x16xf32> to vector<8xf32>
    %28 = vector.shape_cast %27 : vector<8xf32> to vector<8x1xf32>
    %29 = arith.mulf %23, %23 : vector<8x16xf32>
    %cst_20 = arith.constant dense<0.000000e+00> : vector<8xf32>
    %30 = vector.multi_reduction <add>, %29, %cst_20 [1] : vector<8x16xf32> to vector<8xf32>
    %31 = vector.shape_cast %30 : vector<8xf32> to vector<8x1xf32>
    %c0_21 = arith.constant 0 : index
    %c0_22 = arith.constant 0 : index
    %c0_23 = arith.constant 0 : index
    %32 = vector.load %arg5[%c0_21, %c0_22, %c0_23] : memref<1x8x2xf32, #tpu.memory_space<vmem>>, vector<1x8x1xf32>
    %33 = vector.shape_cast %32 : vector<1x8x1xf32> to vector<8x1xf32>
    %34 = vector.shape_cast %28 : vector<8x1xf32> to vector<1x8x1xf32>
    tpu.vector_store %arg5[%c0_21, %c0_22, %c0_23], %34 {strides = array<i32>} : memref<1x8x2xf32, #tpu.memory_space<vmem>>, vector<1x8x1xf32>,
    %c0_24 = arith.constant 0 : index
    %c0_25 = arith.constant 0 : index
    %c1_26 = arith.constant 1 : index
    %35 = vector.load %arg5[%c0_24, %c0_25, %c1_26] : memref<1x8x2xf32, #tpu.memory_space<vmem>>, vector<1x8x1xf32>
    %36 = vector.shape_cast %35 : vector<1x8x1xf32> to vector<8x1xf32>
    %37 = vector.shape_cast %31 : vector<8x1xf32> to vector<1x8x1xf32>
    tpu.vector_store %arg5[%c0_24, %c0_25, %c1_26], %37 {strides = array<i32>} : memref<1x8x2xf32, #tpu.memory_space<vmem>>, vector<1x8x1xf32>,
    return
  }
  func.func @transform_0(%arg0: i32) -> (i32, i32, i32) {
    %c0_i32 = arith.constant 0 : i32
    %c0_i32_0 = arith.constant 0 : i32
    %c0_i32_1 = arith.constant 0 : i32
    return %arg0, %c0_i32, %c0_i32_0 : i32, i32, i32
  }
  func.func @transform_1(%arg0: i32) -> (i32, i32, i32) {
    %c0_i32 = arith.constant 0 : i32
    %c0_i32_0 = arith.constant 0 : i32
    %c0_i32_1 = arith.constant 0 : i32
    %c0_i32_2 = arith.constant 0 : i32
    return %c0_i32, %c0_i32_0, %c0_i32_1 : i32, i32, i32
  }
  func.func @transform_2(%arg0: i32) -> (i32, i32) {
    %c0_i32 = arith.constant 0 : i32
    %c0_i32_0 = arith.constant 0 : i32
    %c0_i32_1 = arith.constant 0 : i32
    return %c0_i32, %c0_i32_0 : i32, i32
  }
  func.func @transform_3(%arg0: i32) -> (i32, i32, i32) {
    %c0_i32 = arith.constant 0 : i32
    %c0_i32_0 = arith.constant 0 : i32
    %c0_i32_1 = arith.constant 0 : i32
    return %arg0, %c0_i32, %c0_i32_0 : i32, i32, i32
  }
  func.func @transform_4(%arg0: i32) -> (i32, i32, i32) {
    %c0_i32 = arith.constant 0 : i32
    %c0_i32_0 = arith.constant 0 : i32
    %c0_i32_1 = arith.constant 0 : i32
    return %arg0, %c0_i32, %c0_i32_0 : i32, i32, i32
  }
}

module attributes {stable_mosaic.version = 11 : i64} {
  func.func @_bn_relu_kernel(%arg0: i32, %arg1: memref<1x8x16xf32, #tpu.memory_space<vmem>>, %arg2: memref<8x1xf32, #tpu.memory_space<vmem>>, %arg3: memref<8x1xf32, #tpu.memory_space<vmem>>, %arg4: memref<1x8x16xf32, #tpu.memory_space<vmem>>) attributes {dimension_semantics = [#tpu.dimension_semantics<parallel>], iteration_bounds = array<i64: 2>, scalar_prefetch = 0 : i64, scratch_operands = 0 : i64, tpu.core_type = #tpu.core_type<tc>, window_params = [{transform_indices = @transform_0, window_bounds = array<i64: 1, 8, 16>}, {pipeline_mode = #tpu.pipeline_mode<synchronous>, transform_indices = @transform_1, window_bounds = array<i64: 8, 1>}, {pipeline_mode = #tpu.pipeline_mode<synchronous>, transform_indices = @transform_2, window_bounds = array<i64: 8, 1>}, {transform_indices = @transform_3, window_bounds = array<i64: 1, 8, 16>}]} {
    %c0 = arith.constant 0 : index
    %c0_0 = arith.constant 0 : index
    %c0_1 = arith.constant 0 : index
    %0 = vector.load %arg1[%c0, %c0_0, %c0_1] : memref<1x8x16xf32, #tpu.memory_space<vmem>>, vector<1x8x16xf32>
    %1 = vector.shape_cast %0 : vector<1x8x16xf32> to vector<8x16xf32>
    %c0_2 = arith.constant 0 : index
    %c0_3 = arith.constant 0 : index
    %2 = vector.load %arg2[%c0_2, %c0_3] : memref<8x1xf32, #tpu.memory_space<vmem>>, vector<8x1xf32>
    %3 = vector.broadcast %2 : vector<8x1xf32> to vector<8x16xf32>
    %4 = arith.mulf %1, %3 : vector<8x16xf32>
    %c0_4 = arith.constant 0 : index
    %c0_5 = arith.constant 0 : index
    %5 = vector.load %arg3[%c0_4, %c0_5] : memref<8x1xf32, #tpu.memory_space<vmem>>, vector<8x1xf32>
    %6 = vector.broadcast %5 : vector<8x1xf32> to vector<8x16xf32>
    %7 = arith.addf %4, %6 : vector<8x16xf32>
    %cst = arith.constant 0.000000e+00 : f32
    %8 = vector.broadcast %cst : f32 to vector<8x16xf32>
    %9 = arith.maximumf %7, %8 : vector<8x16xf32>
    %c0_6 = arith.constant 0 : index
    %c0_7 = arith.constant 0 : index
    %c0_8 = arith.constant 0 : index
    %10 = vector.load %arg4[%c0_6, %c0_7, %c0_8] : memref<1x8x16xf32, #tpu.memory_space<vmem>>, vector<1x8x16xf32>
    %11 = vector.shape_cast %10 : vector<1x8x16xf32> to vector<8x16xf32>
    %12 = vector.shape_cast %9 : vector<8x16xf32> to vector<1x8x16xf32>
    tpu.vector_store %arg4[%c0_6, %c0_7, %c0_8], %12 {strides = array<i32>} : memref<1x8x16xf32, #tpu.memory_space<vmem>>, vector<1x8x16xf32>,
    return
  }
  func.func @transform_0(%arg0: i32) -> (i32, i32, i32) {
    %c0_i32 = arith.constant 0 : i32
    %c0_i32_0 = arith.constant 0 : i32
    %c0_i32_1 = arith.constant 0 : i32
    return %arg0, %c0_i32, %c0_i32_0 : i32, i32, i32
  }
  func.func @transform_1(%arg0: i32) -> (i32, i32) {
    %c0_i32 = arith.constant 0 : i32
    %c0_i32_0 = arith.constant 0 : i32
    %c0_i32_1 = arith.constant 0 : i32
    return %c0_i32, %c0_i32_0 : i32, i32
  }
  func.func @transform_2(%arg0: i32) -> (i32, i32) {
    %c0_i32 = arith.constant 0 : i32
    %c0_i32_0 = arith.constant 0 : i32
    %c0_i32_1 = arith.constant 0 : i32
    return %c0_i32, %c0_i32_0 : i32, i32
  }
  func.func @transform_3(%arg0: i32) -> (i32, i32, i32) {
    %c0_i32 = arith.constant 0 : i32
    %c0_i32_0 = arith.constant 0 : i32
    %c0_i32_1 = arith.constant 0 : i32
    return %arg0, %c0_i32, %c0_i32_0 : i32, i32, i32
  }
}

</mosaic_0001>

<bundles_post_ra>
// kernel: cnn_layer.3
= control target key start
LH: loop header
LB: loop body
LE: loop exit
PB: predicated region body
PF: predicated region fallthrough
CT: control target
= control target key end

     0   :  { %8 = vsyncpa [#allocation3], 0  ;;  %s636_s0 = inlined_call_operand.hbm [shape: f32[2,8,16], index: 0, kind: input, shape index: {}, may-alias: {0,3}]   ;;  %s637_s1 = inlined_call_operand.vmem [shape: f32[8,1], index: 1, kind: input, shape index: {}]   ;;  %s638_s2 = inlined_call_operand.vmem [shape: f32[8,1], index: 2, kind: input, shape index: {}]   ;;  %s639_s3 = inlined_call_operand.hbm [shape: f32[2,8,16], index: 3, kind: output, shape index: {}, may-alias: {0,3}]  }
   0x1   :  { %10 = vsyncpa [#allocation3 + $0x1], 0 }
   0x2   :  { %11 = vsyncpa [#allocation4], 0 }
   0x3   :  { %13 = vsyncpa [#allocation4 + $0x1], 0  ;;  %s469_s12 = smov 0   ;;  %s471_s13 = smov 0  }
   0x4   :  { %s473_s14 = smov 0   ;;  %s475_s15 = smov 0  }
   0x5 LB: > { %s490_s16 = sadd.s32 4294967295, %s444_s15   ;;  %s288_s17 = sadd.s32 4294967294, %s444_s15   ;;  %s444_s15 = sphi %s475_s15, %s654_s15   ;;  %s440_s14 = sphi %s473_s14, %s653_s14   ;;  %s436_s13 = sphi %s471_s13, %s652_s13   ;;  %s432_s12 = sphi %s469_s12, %s651_s12  }
   0x6   : > { %s494_s18 = sadd.s32 1, %s444_s15   ;;  %s26_s19 = sadd.s32 1, %s440_s14 }
   0x7   : > { %s23_s20 = ssub.s32 %s444_s15, %s494_s18  ;;  %p33_p0 = scmp.ne.s32.totalorder %s440_s14, %s436_s13 }
   0x8   : > { %p24_p1 = scmp.eq.s32.totalorder %s23_s20, 0  ;;  %p34_p2 = scmp.eq.s32.totalorder %s444_s15, 0 }
   0x9   : > { %p39_p3 = scmp.ne.s32.totalorder %s436_s13, %s432_s12  ;;  %p40_p4 = scmp.eq.s32.totalorder %s490_s16, 0 }
   0xa   : > { %s506_s21 = scalar_select %p24_p1, %s440_s14, %s26_s19  }
   0xb   : > { %p508_p5 = por %p34_p2, %p33_p0  ;;  %p512_p6 = por %p40_p4, %p39_p3 }
   0xc   : > { %p105_p7 = scmp.eq.s32.totalorder %s490_s16, 1  ;;  %p111_p8 = scmp.eq.s32.totalorder %s288_s17, 1 }
   0xd   : > { %p312_p10 = scmp.lt.s32.totalorder %s444_s15, 2  ;;  %s137_s26 = sand.u32 1, %s440_s14  }
   0xe   : > { %p519_p11 = por %p105_p7, %p33_p0  ;;  %p523_p12 = por %p111_p8, %p39_p3 }
   0xf   : > { %s292_s27 = sshll.u32 %s444_s15, 7  ;;  %s291_s28 = sshll.u32 %s137_s26, 3 }
  0x10   : > { %s643_s24 = scalar_select %p519_p11, 1, 0 }
  0x11   : > { %s644_s25 = scalar_select %p523_p12, 1, 0 }
  0x12   : > { %s532_s4 = scalar_lea.hbm %s636_s0, %s292_s27  ;;  %s141_s5 = scalar_lea.vmem [#allocation2], %s291_s28 }
  0x13   : > { %s148_s6 = sshll.u32 %s141_s5, 4  ;;  %p536_p13 = pnand %p312_p10, %p508_p5  ;;  %s540_s6 = int_to_ptr.vmem [resolvable:$true] %s148_s6 }
  0x14   : > { %s138_s8 = scalar_lea.sflag [#allocation3], %s137_s26  ;;  %s348_s9 = scalar_lea.hbm %s532_s4, 128 }
  0x15   : > { %p349_p2 = scmp.ne.s32.totalorder %s532_s4, %s348_s9  ;;  %p350_p3 = pneg %p536_p13 }
  0x16   : > { %s353_s17 = scalar_lea.hbm %s636_s0, 256  ;;  %p354_p5 = scmp.lt.u32.totalorder %s532_s4, %s636_s0 }
  0x17   : > { %p351_p4 = pnand %p350_p3, %p349_p2  ;;  %p355_p8 = scmp.lt.u32.totalorder %s353_s17, %s348_s9 }
  0x18   : > { %p357_p9 = scmp.lt.u32.totalorder %s348_s9, %s532_s4 }
  0x19   : > { %p352_p7 = pneg %p351_p4  ;;  %p356_p10 = por %p355_p8, %p354_p5 }
  0x1b   : > { %p358_p0 = por %p357_p9, %p356_p10 }
  0x1d   : > { %p359_p1 = pnand %p358_p0, %p352_p7 }
  0x1f   : > { %362 = shalt.err (!%p359_p1)
}
  0x20   : > { %s363_s22 = scalar_lea.vmem %s540_s6, 128  ;;  %s446_s26 = smov [#allocation2]  }
  0x21   : > { %p364_p2 = scmp.ne.s32.totalorder %s540_s6, %s363_s22  ;;  %s368_s27 = sshll.u32 %s446_s26, 4  ;;  %s369_s27 = int_to_ptr.vmem [resolvable:$false] %s368_s27 }
  0x22   : > { %s370_s28 = scalar_lea.vmem %s369_s27, 256  ;;  %p371_p11 = scmp.lt.s32.totalorder %s540_s6, %s369_s27 }
  0x23   : > { %p366_p4 = pnand %p364_p2, %p350_p3  ;;  %p372_p5 = scmp.lt.s32.totalorder %s370_s28, %s363_s22 }
  0x25   : > { %p367_p12 = pneg %p366_p4  ;;  %p373_p8 = por %p372_p5, %p371_p11 }
  0x27   : > { %p374_p9 = pnand %p373_p8, %p367_p12 }
  0x29   : > { %377 = shalt.err (!%p374_p9)
}
  0x2a   : > { %307 = dma.hbm_to_vmem [thread:$0]  (!%p536_p13), %s532_s4, 128, %s540_s6, %s138_s8  }
  0x2b   : > { %p646_p0 = scmp.lt.s32.totalorder %s444_s15, 3  ;;  %p647_p1 = scmp.ge.s32.totalorder %s444_s15, 1 }
  0x2d   : > { %p154_p3 = pnand %p647_p1, %p646_p0 }
  0x2e   : > { %s574_s29 = sand.u32 (!%p154_p3), 1, %s436_s13  }
  0x2f   : > { %157 = sbr.rel (%p154_p3) target bundleno = 207 (0xcf), region = 32  ;;  %s294_s30 = sshll.u32 (!%p154_p3), %s574_s29, 3 }
  0x30   : > { %s160_s5 = scalar_lea.sflag (!%p154_p3), [#allocation3], %s574_s29  ;;  %s163_s9 = scalar_lea.vmem (!%p154_p3), [#allocation2], %s294_s30 }
  0x36   : > { %423 = dma.done.wait (%p512_p6), %s160_s5, 128  }
  0x37   : > { %425 = vsyncadd (%p512_p6), %s160_s5, 4294967168  ;;  %v447_v0 = vmov 0   ;;  %v187_v1 = vld [vmem:[%s637_s1] sm:$0xff]  ;;  %s297_s23 = sshll.u32 %s490_s16, 7  ;;  %s185_s10 = scalar_lea.vmem [#allocation5], %s294_s30  ;;  %vm202_vm0 = vcmask 130048  }
  0x38   : > { %347 = vset.pattern.permute.xlu0 %v447_v0  ;;  %v194_v2 = vld [vmem:[%s638_s2] sm:$0xff]  ;;  %s218_s11 = sshll.u32 %s185_s10, 4  ;;  %s592_s20 = scalar_lea.hbm %s639_s3, %s297_s23  ;;  %s594_s11 = int_to_ptr.vmem [resolvable:$true] %s218_s11 }
  0x39   : > { %190 = vperm.xlu0 %347, %v187_v1   ;;  %v186_v4 = vld [vmem:[%s163_s9] sm:$0xff]  ;;  %s205_s22 = scalar_lea.sflag [#allocation4], %s574_s29  ;;  %s378_s26 = scalar_lea.vmem %s594_s11, 128 }
  0x3a   : > { %p379_p6 = scmp.ne.s32.totalorder %s594_s11, %s378_s26  ;;  %p648_p11 = scmp.ne.s32.totalorder %s643_s24, 0 }
  0x3b   : > { %s448_s16 = smov [#allocation5]  }
  0x3c   : > { %p380_p12 = pnand %p379_p6, %p648_p11  ;;  %s382_s27 = sshll.u32 %s448_s16, 4  ;;  %s383_s27 = int_to_ptr.vmem [resolvable:$false] %s382_s27 }
  0x3d   : > { %197 = vperm.xlu0 %347, %v194_v2   ;;  %s384_s28 = scalar_lea.vmem %s383_s27, 256  ;;  %p385_p7 = scmp.lt.s32.totalorder %s594_s11, %s383_s27 }
  0x3e   : > { %p381_p13 = pneg %p380_p12  ;;  %p386_p10 = scmp.lt.s32.totalorder %s384_s28, %s378_s26 }
  0x40   : > { %p387_p2 = por %p386_p10, %p385_p7 }
  0x42   : > { %p388_p4 = pnand %p387_p2, %p381_p13 }
  0xb8   : > { %v191_v3 = vpop.permute.xlu0 %190 }
  0xb9   : > { %v193_v5 = vmul.f32 %v191_v3, %v186_v4 }
  0xbc   : > { %v198_v6 = vpop.permute.xlu0 %197 }
  0xbd   : > { %v200_v7 = vadd.f32 %v198_v6, %v193_v5 }
  0xbf   : > { %v201_v8 = vmax.f32 %v200_v7, 0.0 }
  0xc1   : > { %203 = vst.msk [vmem:[%s185_s10] sm:$0xff] %vm202_vm0, %v201_v8 }
  0xc2   : > { %391 = shalt.err (!%p388_p4)
}
  0xc3   : > { %s392_s29 = scalar_lea.hbm %s592_s20, 128  ;;  %s396_s9 = scalar_lea.hbm %s639_s3, 256 }
  0xc4   : > { %p393_p5 = scmp.ne.s32.totalorder %s592_s20, %s392_s29  ;;  %p397_p0 = scmp.lt.u32.totalorder %s592_s20, %s639_s3 }
  0xc5   : > { %p398_p1 = scmp.lt.u32.totalorder %s396_s9, %s392_s29  ;;  %p400_p6 = scmp.lt.u32.totalorder %s392_s29, %s592_s20 }
  0xc6   : > { %p394_p8 = pnand %p393_p5, %p648_p11 }
  0xc7   : > { %p399_p3 = por %p398_p1, %p397_p0 }
  0xc8   : > { %p395_p9 = pneg %p394_p8 }
  0xc9   : > { %p401_p12 = por %p400_p6, %p399_p3 }
  0xcb   : > { %p402_p13 = pnand %p401_p12, %p395_p9 }
  0xcd   : > { %405 = shalt.err (!%p402_p13)
}
  0xce   : > { %302 = dma.vmem_to_hbm [thread:$0]  (%p648_p11), %s594_s11, 128, %s592_s20, %s205_s22  }
  0xcf PF: > { %s230_s7 = sand.u32 1, %s432_s12   ;;  %p649_p7 = scmp.ne.s32.totalorder %s644_s25, 0 }
  0xd0   : > { %p650_p10 = scmp.ge.s32.totalorder %s444_s15, 2  ;;  %s231_s8 = scalar_lea.sflag [#allocation4], %s230_s7 }
  0xd2   : > { %p309_p2 = pnand %p650_p10, %p649_p7 }
  0xd4   : > { %427 = dma.done.wait (!%p309_p2), %s231_s8, 128  }
  0xd5   : > { %429 = vsyncadd (!%p309_p2), %s231_s8, 4294967168  ;;  %p16_p4 = scmp.ge.s32.totalorder %s494_s18, 4   ;;  %s651_s12 = smov %s436_s13 }
  0xd6   : > { %s652_s13 = smov %s440_s14  ;;  %s653_s14 = smov %s506_s21 }
  0xd7   : > { %s654_s15 = smov %s494_s18  ;;  %18 = sbr.rel (!%p16_p4) target bundleno = 5 (0x5), region = 77 }
  0xde   :  { %236 = vsyncpa [#allocation3], 1 }
  0xdf   :  { %238 = vsyncpa [#allocation3 + $0x1], 1 }
  0xe0   :  { %239 = vsyncpa [#allocation4], 1 }
  0xe1   :  { %241 = vsyncpa [#allocation4 + $0x1], 1 }

// kernel: cnn_layer.2
= control target key start
LH: loop header
LB: loop body
LE: loop exit
PB: predicated region body
PF: predicated region fallthrough
CT: control target
= control target key end

     0   :  { %10 = vsyncpa [#allocation3], 0  ;;  %s879_s0 = inlined_call_operand.vmem [shape: f32[2,4,16], index: 0, kind: input, shape index: {}]   ;;  %s880_s1 = inlined_call_operand.vmem [shape: f32[3,8,4], index: 1, kind: input, shape index: {}]   ;;  %s881_s2 = inlined_call_operand.vmem [shape: f32[8,1], index: 2, kind: input, shape index: {}]   ;;  %s882_s3 = inlined_call_operand.hbm [shape: f32[2,8,16], index: 3, kind: output, shape index: {0}]   ;;  %s883_s4 = inlined_call_operand.vmem [shape: f32[2,8,2], index: 4, kind: output, shape index: {1}]  }
   0x1   :  { %12 = vsyncpa [#allocation3 + $0x1], 0  ;;  %s755_s15 = smov 0   ;;  %s757_s16 = smov 0  }
   0x2   :  { %s759_s17 = smov 0   ;;  %s761_s18 = smov 0  }
   0x3 LB: > { %s776_s19 = sadd.s32 4294967295, %s722_s18   ;;  %s574_s20 = sadd.s32 4294967294, %s722_s18   ;;  %s722_s18 = sphi %s761_s18, %s889_s18   ;;  %s718_s17 = sphi %s759_s17, %s888_s17   ;;  %s714_s16 = sphi %s757_s16, %s887_s16   ;;  %s710_s15 = sphi %s755_s15, %s886_s15  }
   0x4   : > { %s780_s21 = sadd.s32 1, %s722_s18   ;;  %s93_s22 = sadd.s32 1, %s718_s17 }
   0x5   : > { %s90_s23 = ssub.s32 %s722_s18, %s780_s21  ;;  %p103_p0 = scmp.ne.s32.totalorder %s718_s17, %s714_s16 }
   0x6   : > { %p91_p1 = scmp.eq.s32.totalorder %s90_s23, 0  ;;  %p104_p2 = scmp.eq.s32.totalorder %s776_s19, 1 }
   0x7   : > { %p109_p3 = scmp.ne.s32.totalorder %s714_s16, %s710_s15  ;;  %p110_p4 = scmp.eq.s32.totalorder %s574_s20, 1 }
   0x8   : > { %s791_s24 = scalar_select %p91_p1, %s718_s17, %s93_s22  }
   0x9   : > { %p793_p5 = por %p104_p2, %p103_p0  ;;  %p797_p6 = por %p110_p4, %p109_p3 }
   0xa   : > { %p577_p7 = scmp.ge.s32.totalorder %s722_s18, 1  ;;  %p167_p8 = scmp.lt.s32.totalorder %s722_s18, 3 }
   0xc   : > { %p168_p9 = pnand %p577_p7, %p167_p8 }
   0xd   : > { %p196_p10 = scmp.lt.s32.totalorder (!%p168_p9), %s776_s19, 1  ;;  %v724_v0 = vmov (!%p168_p9), 0.0   ;;  %vm725_vm0 = vmmov (!%p168_p9), 0   ;;  %v451_v1 = vld [vmem:[%s881_s2] sm:$0xff] (!%p168_p9)  ;;  %v726_v2 = vmov (!%p168_p9), 0   ;;  %vm218_vm1 = vcmask (!%p168_p9), 1043456  }
   0xe   : > { %171 = sbr.rel (%p168_p9) target bundleno = 509 (0x1fd), region = 32  ;;  %604 = vmatprep.subr.mxu1 (!%p168_p9), %v724_v0  ;;  %599 = vmatprep.subr.mxu0 (!%p168_p9), %v724_v0  ;;  %v581_v3 = vld [vmem:[%s880_s1 + $0x8] sm:$0xff] (!%p168_p9)  ;;  %vm214_vm2 = vcmask (!%p168_p9), 31744   ;;  %s727_s10 = smov (!%p168_p9), 1   ;;  %vm209_vm3 = vcmask (!%p168_p9), 7168   ;;  %v211_v6 = vld [vmem:[%s880_s1] sm:$0xff] (!%p168_p9) }
   0xf   : > { %601 = vmatprep.mubr.msk.f32.mxu0 (!%p168_p9), %vm725_vm0, %v724_v0  ;;  %606 = vmatprep.mubr.msk.f32.mxu1 (!%p168_p9), %vm725_vm0, %v724_v0  ;;  %s728_s11 = smov (!%p168_p9), 127   ;;  %vm370_vm4 = vcmask (!%p168_p9), 121856   ;;  %v586_v9 = vld [vmem:[%s880_s1 + $0x10] sm:$0xff] (!%p168_p9)  ;;  %s187_s22 = sand.u32 (!%p168_p9), 1, %s714_s16   ;;  %vm458_vm5 = vcmask (!%p168_p9), 130048  }
  0x10   : > { %658 = vset.pattern.permute.xlu1 (!%p168_p9), %v726_v2  ;;  %659 = vset.pattern.permute.xlu0 (!%p168_p9), %v726_v2  ;;  %s578_s23 = sshll.u32 (!%p168_p9), %s187_s22, 3  ;;  %s590_s29 = sshll.u32 (!%p168_p9), %s776_s19, 7 }
  0x11   : > { %454 = vperm.xlu1 (!%p168_p9), %658, %v451_v1   ;;  %s189_s28 = scalar_lea.vmem (!%p168_p9), [#allocation2], %s578_s23  ;;  %s471_s8 = scalar_lea.sflag (!%p168_p9), [#allocation3], %s187_s22 }
  0x15   : > { %s805_s27 = scalar_select %p196_p10, %s776_s19, 1 }
  0x17   : > { %s579_s30 = sshll.u32 %s805_s27, 2 }
  0x18   : > { %s199_s7 = scalar_lea.vmem %s879_s0, %s579_s30  ;;  %s488_s30 = sshll.u32 %s189_s28, 4  ;;  %s489_s30 = int_to_ptr.vmem [resolvable:$true] %s488_s30 }
  0x19   : > { %v204_v4 = vld [vmem:[%s199_s7] sm:$0xf]  ;;  %s838_s7 = scalar_lea.hbm %s882_s3, %s590_s29  ;;  %s660_s9 = scalar_lea.vmem %s489_s30, 128 }
  0x1a   : > { %206 = vrot.lane.b32.xlu0 %v204_v4, %s727_s10  ;;  %600 = vmatpush3.msk.msra.mxu0 %vm218_vm1, %v204_v4  ;;  %p661_p11 = scmp.ne.s32.totalorder %s489_s30, %s660_s9  ;;  %s729_s10 = smov [#allocation2]  }
  0x1b   : > { %602 = vmatmul.mubr.msk.f32.vlgmr.msra.gmra.mrb[0].mxu0 %vm214_vm2, %v581_v3  ;;  %609 = vmatprep.subr.mxu0 %v724_v0 }
  0x1c   : > { %611 = vmatprep.mubr.msk.f32.mxu0 %vm725_vm0, %v724_v0  ;;  %p662_p12 = pnand %p661_p11, %p793_p5 }
  0x1e   : > { %367 = vrot.lane.b32.xlu0 %v204_v4, %s728_s11  ;;  %p663_p13 = pneg %p662_p12  ;;  %s664_s11 = sshll.u32 %s729_s10, 4  ;;  %s665_s11 = int_to_ptr.vmem [resolvable:$false] %s664_s11 }
  0x1f   : > { %s666_s12 = scalar_lea.vmem %s665_s11, 256  ;;  %p667_p0 = scmp.lt.s32.totalorder %s489_s30, %s665_s11 }
  0x20   : > { %p668_p1 = scmp.lt.s32.totalorder %s666_s12, %s660_s9 }
  0x22   : > { %p669_p2 = por %p668_p1, %p667_p0 }
  0x24   : > { %p670_p3 = pnand %p669_p2, %p663_p13 }
  0x8c   : > { %v207_v5 = vpop.permute.xlu0 %206 }
  0x8d   : > { %v210_v7 = vsel %vm209_vm3, 0.0, %v207_v5 }
  0x8e   : > { %605 = vmatpush3.msk.msra.mxu1 %vm218_vm1, %v210_v7 }
  0x8f   : > { %607 = vmatmul.mubr.msk.f32.vlgmr.msra.gmra.mrb[0].mxu1 %vm214_vm2, %v211_v6 }
  0x90   : > { %v368_v8 = vpop.permute.xlu0 %367  ;;  %v455_v17 = vpop.permute.xlu1 %454 }
  0x91   : > { %v371_v10 = vsel %vm370_vm4, %v368_v8, 0.0 }
  0x92   : > { %610 = vmatpush3.msk.msra.mxu0 %vm218_vm1, %v371_v10 }
  0x93   : > { %612 = vmatmul.mubr.msk.f32.vlgmr.msra.gmra.mrb[2].mxu0 %vm214_vm2, %v586_v9 }
  0xee   : > { %v287_v11 = vpop.f32.mrb[0].mxu0 }
  0xef   : > { %v603_v12 = vpop.f32.mrb[1].mxu0 }
 0x162   : > { %v363_v13 = vpop.f32.mrb[0].mxu1 }
 0x163   : > { %v364_v14 = vadd.f32 %v363_v13, %v287_v11  ;;  %v608_v15 = vpop.f32.mrb[1].mxu1 }
 0x166   : > { %v446_v16 = vpop.f32.mrb[2].mxu0 }
 0x167   : > { %v450_v18 = vadd.f32 %v446_v16, %v364_v14  ;;  %v613_v19 = vpop.f32.mrb[3].mxu0 }
 0x169   : > { %v457_v20 = vadd.f32 %v455_v17, %v450_v18 }
 0x16b   : > { %v460_v21 = vsel %vm458_vm5, %v457_v20, 0.0  ;;  %v463_v22 = vmul.f32 %v457_v20, %v457_v20  ;;  %459 = vst.msk [vmem:[%s189_s28] sm:$0xff] %vm458_vm5, %v457_v20 }
 0x16c   : > { %461 = vadd.xlane.f32.xlu1 %v460_v21 }
 0x16d   : > { %v464_v23 = vsel %vm458_vm5, %v463_v22, 0.0 }
 0x16e   : > { %465 = vadd.xlane.f32.xlu0 %v464_v23 }
 0x16f   : > { %673 = shalt.err (!%p670_p3)
}
 0x170   : > { %s674_s19 = scalar_lea.hbm %s838_s7, 128  ;;  %s678_s20 = scalar_lea.hbm %s882_s3, 256 }
 0x171   : > { %p675_p4 = scmp.ne.s32.totalorder %s838_s7, %s674_s19  ;;  %p679_p9 = scmp.lt.u32.totalorder %s838_s7, %s882_s3 }
 0x172   : > { %p680_p10 = scmp.lt.u32.totalorder %s678_s20, %s674_s19  ;;  %p682_p12 = scmp.lt.u32.totalorder %s674_s19, %s838_s7 }
 0x173   : > { %p676_p7 = pnand %p675_p4, %p793_p5 }
 0x174   : > { %p681_p11 = por %p680_p10, %p679_p9 }
 0x175   : > { %p677_p8 = pneg %p676_p7 }
 0x176   : > { %p683_p13 = por %p682_p12, %p681_p11 }
 0x178   : > { %p684_p0 = pnand %p683_p13, %p677_p8 }
 0x17a   : > { %687 = shalt.err (!%p684_p0)
}
 0x17b   : > { %614 = dma.vmem_to_hbm [thread:$0]  (%p793_p5), %s489_s30, 128, %s838_s7, %s471_s8   ;;  %vm468_vm6 = vcmask 15368  }
 0x17c   : > { %s580_s28 = sshll.u32 %s805_s27, 3 }
 0x17d   : > { %s203_s6 = scalar_lea.vmem %s883_s4, %s580_s28 }
 0x1f9   : > { %v462_v24 = vpop.xlane.xlu1 %461 }
 0x1fa   : > { %467 = vst.msk [vmem:[%s203_s6] sm:$0xff] %vm209_vm3, %v462_v24 }
 0x1fb   : > { %v466_v25 = vpop.xlane.xlu0 %465 }
 0x1fc   : > { %469 = vst.msk [vmem:[%s203_s6] sm:$0xff] %vm468_vm6, %v466_v25 }
 0x1fd PF: > { %p620_p1 = scmp.ge.s32.totalorder %s722_s18, 2  ;;  %s503_s25 = sand.u32 1, %s710_s15  }
 0x1fe   : > { %s504_s30 = scalar_lea.sflag [#allocation3], %s503_s25 }
 0x1ff   : > { %p617_p2 = pnand %p620_p1, %p797_p6 }
 0x201   : > { %705 = dma.done.wait (!%p617_p2), %s504_s30, 128  }
 0x202   : > { %707 = vsyncadd (!%p617_p2), %s504_s30, 4294967168  ;;  %p15_p5 = scmp.ge.s32.totalorder %s780_s21, 4   ;;  %s886_s15 = smov %s714_s16 }
 0x203   : > { %s887_s16 = smov %s718_s17  ;;  %s888_s17 = smov %s791_s24 }
 0x204   : > { %s889_s18 = smov %s780_s21  ;;  %17 = sbr.rel (!%p15_p5) target bundleno = 3 (0x3), region = 81 }
 0x20b   :  { %516 = vsyncpa [#allocation3], 1 }
 0x20c   :  { %518 = vsyncpa [#allocation3 + $0x1], 1 }

</bundles_post_ra>
